<compile_context>
chip_gen: v5e
topology: v5e:2x2
jax: 0.10.0
libtpu: 0.0.40
codegen_flags: <defaults>
</compile_context>

<pallas_src>
import copy
import functools

import jax
import jax.numpy as jnp
from jax.experimental import pallas as pl
from jax.experimental.pallas import tpu as pltpu

LANE = 128
EMA_TILE_ROWS = 2048     # (2048, 128) f32 tile = 1 MiB; ~85% HBM roofline,
                         # double-buffered footprint ~6 MiB -> safe on v5e too
MEAN_COL_TILE = 2048     # columns per reduction step for the batched means


def _sublane_align(dtype):
    """Minimum sublane multiple for a packed dtype: 8 (f32), 16 (bf16), 32 (i8)."""
    return {4: 8, 2: 16, 1: 32}[jnp.dtype(dtype).itemsize]


# ----------------------------------------------------------------------------
# Parameter slab packing (done ONCE at init; params stay resident in this
# layout so the EMA hot path never pads/unpads)
# ----------------------------------------------------------------------------
def pack_params(params, tile_rows=EMA_TILE_ROWS, slab_dtype=jnp.float32):
    """Flatten a dict of parameters into one lane-dense (rows, 128) slab.

    The slab dtype defaults to float32: with beta=0.999 the EMA update is
    ~1e-3 * delta, which a bf16 store would silently round away.
    # TODO(synk): if bf16 storage is ever required, cast back with
    # pltpu.stochastic_round instead of a plain astype.

    Returns (slab, meta, tile_rows_used).  meta[name] = (offset, size, shape, dtype).
    rows is a multiple of the chosen tile row count so the grid divides evenly.
    """
    names = list(params)
    sub = _sublane_align(slab_dtype)
    meta = {}
    flats = []
    off = 0
    for name in names:
        p = params[name]
        size = int(p.size)
        meta[name] = (off, size, p.shape, p.dtype)
        flats.append(p.reshape(-1).astype(slab_dtype))
        off += size
    n = off
    rows = -(-n // LANE)                     # ceil(n / 128)
    rows = max(sub, -(-rows // sub) * sub)   # round up to packed-sublane multiple
    tr = min(tile_rows, rows)
    tr = -(-tr // sub) * sub                 # tile rows aligned too
    rows = -(-rows // tr) * tr               # round up to multiple of the tile
    flat = jnp.concatenate(flats)
    slab = jnp.pad(flat, (0, rows * LANE - n)).reshape(rows, LANE)
    return slab, meta, tr


def unpack_params(slab, meta):
    """Materialize the per-parameter views from the slab (verification only)."""
    flat = slab.reshape(-1)
    return {
        name: flat[off:off + size].reshape(shape).astype(dtype)
        for name, (off, size, shape, dtype) in meta.items()
    }


# ----------------------------------------------------------------------------
# Kernel 1: fused EMA parameter update  (update_average)
#   out = beta * tgt + (1 - beta) * src     (one launch for ALL params)
# ----------------------------------------------------------------------------
def _ema_kernel(beta_ref, tgt_ref, src_ref, out_ref):
    beta = beta_ref[0]                               # SMEM scalar
    t = tgt_ref[...].astype(jnp.float32)
    s = src_ref[...].astype(jnp.float32)
    out_ref[...] = (beta * t + (1.0 - beta) * s).astype(out_ref.dtype)


def _ema_update_slab_impl(tgt_slab, src_slab, beta_arr, tr):
    rows, lanes = tgt_slab.shape
    return pl.pallas_call(
        _ema_kernel,
        out_shape=jax.ShapeDtypeStruct((rows, lanes), tgt_slab.dtype),
        grid=(rows // tr,),
        in_specs=[
            pl.BlockSpec(memory_space=pltpu.MemorySpace.SMEM),   # beta scalar
            pl.BlockSpec((tr, lanes), lambda i: (i, 0)),          # tgt (EMA)
            pl.BlockSpec((tr, lanes), lambda i: (i, 0)),          # src
        ],
        out_specs=pl.BlockSpec((tr, lanes), lambda i: (i, 0)),
        input_output_aliases={1: 0},   # in-place update of the gen_test slab
        compiler_params=pltpu.CompilerParams(
            dimension_semantics=("parallel",)),      # shards across v7x cores
    )(beta_arr, tgt_slab, src_slab)


# Donate the target slab so the aliasing is real (no defensive copy).
ema_update_slab = jax.jit(_ema_update_slab_impl,
                          static_argnums=(3,), donate_argnums=(0,))


# ----------------------------------------------------------------------------
# Kernel 2: batched row sums (all torch.mean(loss) calls in one launch)
#   column-tiled reduction; lane-parallel VPU accumulation per step, single
#   cross-lane reduce only in the final grid step; lane-dense output
# ----------------------------------------------------------------------------
def _row_sums_kernel(x_ref, o_ref, acc_ref):
    j = pl.program_id(0)

    @pl.when(j == 0)
    def _():
        acc_ref[...] = jnp.zeros_like(acc_ref)

    # Lane-parallel partial sums: plain vld+vadd per 128-lane chunk, no
    # per-iteration XLU cross-lane reduce or broadcast.
    n_chunks = x_ref.shape[1] // LANE
    for c in range(n_chunks):
        acc_ref[...] += x_ref[:, c * LANE:(c + 1) * LANE]

    @pl.when(j == pl.num_programs(0) - 1)
    def _():
        row_sum = jnp.sum(acc_ref[...], axis=1, keepdims=True)
        o_ref[...] = jnp.broadcast_to(row_sum, o_ref.shape)


@functools.partial(jax.jit, static_argnums=(1, 2, 3, 4))
def _batched_means_impl(flats, counts, ncols, l_pad, tc):
    # Slab assembly lives INSIDE the jit so pad/stack fuse with the launch.
    num = len(flats)
    rows = [jnp.pad(f.astype(jnp.float32), (0, ncols - f.shape[0]))
            for f in flats]
    slab = jnp.stack(rows)
    if l_pad > num:
        slab = jnp.pad(slab, ((0, l_pad - num), (0, 0)))

    sums = pl.pallas_call(
        _row_sums_kernel,
        out_shape=jax.ShapeDtypeStruct((l_pad, LANE), jnp.float32),
        grid=(ncols // tc,),
        in_specs=[pl.BlockSpec((l_pad, tc), lambda j: (0, j))],
        out_specs=pl.BlockSpec((l_pad, LANE), lambda j: (0, 0)),
        scratch_shapes=[pltpu.VMEM((l_pad, LANE), jnp.float32)],
        # TODO(synk): for very large loss tensors, add a parallel leading grid
        # axis (per-core partial accumulators + combine) so both v7x TCs work.
        compiler_params=pltpu.CompilerParams(
            dimension_semantics=("arbitrary",)),
    )(slab)

    denom = jnp.asarray(counts, jnp.float32)
    return sums[:num, 0] / denom            # one small output array


def batched_loss_means(loss_tensors, col_tile=MEAN_COL_TILE):
    """Mean of each loss tensor, all computed in a single pallas_call.

    Returns a dict name -> scalar; the device result comes back as ONE array
    and is split on the host.
    """
    # TODO(synk): for wildly mixed loss sizes (per-pixel vs scalar), pack all
    # losses into one flat (rows,128) slab with per-loss (offset,count) scalar
    # prefetch and do segmented sums instead of padding every row to max len.
    names = list(loss_tensors)
    flats = [loss_tensors[n].reshape(-1) for n in names]
    counts = tuple(int(f.shape[0]) for f in flats)

    ncols = max(LANE, -(-max(counts) // LANE) * LANE)
    tc = min(col_tile, ncols)
    ncols = -(-ncols // tc) * tc
    l_pad = max(8, -(-len(names) // 8) * 8)

    out = _batched_means_impl(flats, counts, ncols, l_pad, tc)
    host = jax.device_get(out)               # single transfer
    return {name: host[i] for i, name in enumerate(names)}


# ----------------------------------------------------------------------------
# Trainer: JAX-side mirror of the PyTorch module's structure
# ----------------------------------------------------------------------------
def _weights_init_gaussian(key, shapes):
    """weights_init('gaussian'): weights ~ N(0, 0.02), biases = 0."""
    params = {}
    for name, shape in shapes.items():
        if name.endswith("bias"):
            params[name] = jnp.zeros(shape, jnp.float32)
        else:
            key, sub = jax.random.split(key)
            params[name] = 0.02 * jax.random.normal(sub, shape, jnp.float32)
    return params, key


class Trainer:
    """JAX mirror of the PyTorch Trainer.

    Generator params and their EMA copy are kept resident in padded
    lane-dense float32 slabs; the per-file tensor math (update_average, loss
    means) runs through the Pallas kernels above.
    """

    def __init__(self, cfg, key):
        # TODO(synk): FUNITModel (generator/discriminator nets), RMSprop
        # optimizers, lr schedulers and checkpoint save/load/resume are
        # host-side or undefined in the provided source; not translated.
        gen_shapes = {
            # small FUNIT-ish generator stand-ins (OIHW conv weights + biases)
            "conv1.weight": (32, 4, 3, 3),
            "conv1.bias": (32,),
            "conv2.weight": (64, 32, 3, 3),
            "conv2.bias": (64,),
            "fc.weight": (64, 64),
            "fc.bias": (64,),
        }
        gen_params, key = _weights_init_gaussian(key, gen_shapes)
        self.gen_slab, self.gen_meta, self.tile_rows = pack_params(gen_params)
        # self.model.gen_test = copy.deepcopy(self.model.gen)
        self.gen_test_slab = jnp.copy(self.gen_slab)
        self._key = key

    # views (verification / export only; hot path stays in slab form)
    def gen_params(self):
        return unpack_params(self.gen_slab, self.gen_meta)

    def gen_test_params(self):
        return unpack_params(self.gen_test_slab, self.gen_meta)

    def update_average(self, beta=0.999):
        """update_average(gen_test, gen): ONE fused Pallas EMA launch."""
        beta_arr = jnp.asarray([beta], jnp.float32)   # SMEM scalar, no recompile
        self.gen_test_slab = ema_update_slab(
            self.gen_test_slab, self.gen_slab, beta_arr, self.tile_rows)

    def loss_means(self, loss_tensors):
        """torch.mean(...) of every loss tensor in a single Pallas launch."""
        return batched_loss_means(loss_tensors)

    def forward(self, *inputs):
        # Exact semantics of the PyTorch forward: print message, return None.
        print("Forward function not implemented.")
        return None


# ----------------------------------------------------------------------------
# main
# ----------------------------------------------------------------------------
if __name__ == "__main__":
    key = jax.random.PRNGKey(0)
    cfg = {"lr_gen": 1e-4, "lr_dis": 1e-4, "weight_decay": 1e-4,
           "init": "gaussian", "lr_policy": "constant"}

    trainer = Trainer(cfg, key)

    # Example content / class inputs (unused by forward(), as in the source).
    key, k1, k2 = jax.random.split(jax.random.PRNGKey(0), 3)
    co_data = jax.random.normal(k1, (2, 4, 16, 16), jnp.float32)
    cl_data = jax.random.normal(k2, (2, 4, 16, 16), jnp.float32)
    trainer.forward(co_data, cl_data)

    # Snapshot the EMA copy before the update (separate buffers, safe w.r.t.
    # the in-place aliased update).
    old_gen_test = copy.deepcopy(trainer.gen_test_params())

    # Simulate an optimizer step having moved `gen` (so EMA does real work).
    key, ksub = jax.random.split(key)
    trainer.gen_slab = trainer.gen_slab + 0.01 * jax.random.normal(
        ksub, trainer.gen_slab.shape, trainer.gen_slab.dtype)
    new_gen = trainer.gen_params()

    # --- Pallas kernel 1: fused, in-place EMA update (update_average) ---
    trainer.update_average(beta=0.999)
    jax.block_until_ready(trainer.gen_test_slab)
    new_gen_test = trainer.gen_test_params()

    # --- Pallas kernel 2: batched loss means (gen_update's torch.mean) ---
    key, *lkeys = jax.random.split(key, 8)
    loss_names = ["al", "ad", "xr", "xpaired", "cr", "sr", "ac"]
    loss_tensors = {
        name: jax.random.normal(lk, (2, 37), jnp.float32) ** 2
        for name, lk in zip(loss_names, lkeys)
    }
    means = trainer.loss_means(loss_tensors)

    # --- verify against plain-JAX references ---
    ok = True
    for name in old_gen_test:
        ref = 0.999 * old_gen_test[name] + 0.001 * new_gen[name]
        ok &= bool(jnp.allclose(new_gen_test[name], ref,
                                rtol=1e-5, atol=1e-6))
    for name, t in loss_tensors.items():
        ok &= bool(jnp.allclose(means[name], jnp.mean(t),
                                rtol=1e-5, atol=1e-6))

    if ok:
        print("KERNEL_OK")
    else:
        raise SystemExit("mismatch vs reference")
</pallas_src>

<mosaic_0001>
module attributes {stable_mosaic.version = 11 : i64} {
  func.func @_ema_kernel(%arg0: i32, %arg1: memref<1xf32, #tpu.memory_space<smem>>, %arg2: memref<192x128xf32, #tpu.memory_space<vmem>>, %arg3: memref<192x128xf32, #tpu.memory_space<vmem>>, %arg4: memref<192x128xf32, #tpu.memory_space<vmem>>) attributes {dimension_semantics = [#tpu.dimension_semantics<parallel>], iteration_bounds = array<i64: 1>, scalar_prefetch = 0 : i64, scratch_operands = 0 : i64, tpu.core_type = #tpu.core_type<tc>, window_params = [{transform_indices = @transform_0, window_bounds = array<i64: 1>}, {transform_indices = @transform_1, window_bounds = array<i64: 192, 128>}, {transform_indices = @transform_2, window_bounds = array<i64: 192, 128>}, {transform_indices = @transform_3, window_bounds = array<i64: 192, 128>}]} {
    %c0 = arith.constant 0 : index
    %0 = memref.load %arg1[%c0] : memref<1xf32, #tpu.memory_space<smem>>
    %c0_0 = arith.constant 0 : index
    %c0_1 = arith.constant 0 : index
    %1 = vector.load %arg2[%c0_0, %c0_1] : memref<192x128xf32, #tpu.memory_space<vmem>>, vector<192x128xf32>
    %c0_2 = arith.constant 0 : index
    %c0_3 = arith.constant 0 : index
    %2 = vector.load %arg3[%c0_2, %c0_3] : memref<192x128xf32, #tpu.memory_space<vmem>>, vector<192x128xf32>
    %3 = vector.broadcast %0 : f32 to vector<192x128xf32>
    %4 = arith.mulf %3, %1 : vector<192x128xf32>
    %cst = arith.constant 1.000000e+00 : f32
    %5 = arith.subf %cst, %0 : f32
    %6 = vector.broadcast %5 : f32 to vector<192x128xf32>
    %7 = arith.mulf %6, %2 : vector<192x128xf32>
    %8 = arith.addf %4, %7 : vector<192x128xf32>
    %c0_4 = arith.constant 0 : index
    %c0_5 = arith.constant 0 : index
    %9 = vector.load %arg4[%c0_4, %c0_5] : memref<192x128xf32, #tpu.memory_space<vmem>>, vector<192x128xf32>
    tpu.vector_store %arg4[%c0_4, %c0_5], %8 {strides = array<i32>} : memref<192x128xf32, #tpu.memory_space<vmem>>, vector<192x128xf32>,
    return
  }
  func.func @transform_0(%arg0: i32) -> i32 {
    %c0_i32 = arith.constant 0 : i32
    %c0_i32_0 = arith.constant 0 : i32
    return %c0_i32 : i32
  }
  func.func @transform_1(%arg0: i32) -> (i32, i32) {
    %c0_i32 = arith.constant 0 : i32
    %c0_i32_0 = arith.constant 0 : i32
    return %arg0, %c0_i32 : i32, i32
  }
  func.func @transform_2(%arg0: i32) -> (i32, i32) {
    %c0_i32 = arith.constant 0 : i32
    %c0_i32_0 = arith.constant 0 : i32
    return %arg0, %c0_i32 : i32, i32
  }
  func.func @transform_3(%arg0: i32) -> (i32, i32) {
    %c0_i32 = arith.constant 0 : i32
    %c0_i32_0 = arith.constant 0 : i32
    return %arg0, %c0_i32 : i32, i32
  }
}

</mosaic_0001>

<bundles_post_ra>
// kernel: _ema_update_slab_impl.1
= control target key start
LH: loop header
LB: loop body
LE: loop exit
PB: predicated region body
PF: predicated region fallthrough
CT: control target
= control target key end

     0   :  { %9 = vsyncpa [#allocation4], 0  ;;  %s400_s0 = inlined_call_operand.<no memory space> [shape: f32[1], index: 0, kind: input, shape index: {}]   ;;  %s401_s1 = inlined_call_operand.hbm [shape: f32[192,128], index: 1, kind: input, shape index: {}, may-alias: {1,3}]   ;;  %s402_s2 = inlined_call_operand.hbm [shape: f32[192,128], index: 2, kind: input, shape index: {}]   ;;  %s403_s3 = inlined_call_operand.hbm [shape: f32[192,128], index: 3, kind: output, shape index: {}, may-alias: {1,3}]  }
   0x1   :  { %10 = vsyncpa [#allocation7], 0 }
   0x2   :  { %11 = vsyncpa [#allocation5], 0  ;;  %s18_s14 = sshll.u32 %s401_s1, 4  ;;  %s299_s15 = smov [#allocation3]   ;;  %s19_s14 = int_to_ptr.hbm [resolvable:$true] %s18_s14 }
   0x3   :  { %s20_s16 = sshll.u32 %s299_s15, 4  ;;  %s31_s19 = sshll.u32 %s402_s2, 4  ;;  %s21_s16 = int_to_ptr.vmem [resolvable:$true] %s20_s16  ;;  %s32_s19 = int_to_ptr.hbm [resolvable:$true] %s31_s19 }
   0x4   :  { %s300_s20 = smov 128   ;;  %s301_s21 = smov 8  }
   0x5   :  { %26 = dma.hbm_to_vmem [thread:$0]  %s19_s14, 3072, %s21_s16, [#allocation4], %s300_s20, %s300_s20, %s301_s21  }
   0x6   :  { %s302_s22 = smov [#allocation6]  }
   0x7   :  { %s33_s23 = sshll.u32 %s302_s22, 4  ;;  %s34_s23 = int_to_ptr.vmem [resolvable:$true] %s33_s23 }
   0x8   :  { %39 = dma.hbm_to_vmem [thread:$0]  %s32_s19, 3072, %s34_s23, [#allocation7], %s300_s20, %s300_s20, %s301_s21  }
   0x9   :  { %293 = dma.done.wait [#allocation4], 3072  }
   0xa   :  { %294 = vsyncadd [#allocation4], 4294964224 }
   0xb   :  { %295 = dma.done.wait [#allocation7], 3072  }
   0xc   :  { %296 = vsyncadd [#allocation7], 4294964224  ;;  %s122_s24 = ssub.f32 1.0, %s400_s0  ;;  %v342_v0 = vstv %s400_s0  ;;  %v49_v2 = vld [vmem:[#allocation3] sm:$0xff]  ;;  %v50_v4 = vld [vmem:[#allocation3 + $0x8] sm:$0xff]  ;;  %s303_s0 = smov [#allocation8]  }
   0xd   :  { %v73_v3 = vld [vmem:[#allocation6] sm:$0xff]  ;;  %v98_v5 = vmul.f32 %v342_v0, %v49_v2  ;;  %v74_v7 = vld [vmem:[#allocation6 + $0x8] sm:$0xff]  ;;  %v99_v8 = vmul.f32 %v342_v0, %v50_v4  ;;  %v51_v9 = vld [vmem:[#allocation3 + $0x10] sm:$0xff]  ;;  %s200_s27 = sshll.u32 %s303_s0, 4  ;;  %s202_s30 = sshll.u32 %s403_s3, 4  ;;  %s201_s27 = int_to_ptr.vmem [resolvable:$true] %s200_s27  ;;  %s203_s30 = int_to_ptr.hbm [resolvable:$true] %s202_s30 }
   0xe   :  { %v344_v1 = vstv %s122_s24  ;;  %v75_v10 = vld [vmem:[#allocation6 + $0x10] sm:$0xff]  ;;  %v100_v12 = vmul.f32 %v342_v0, %v51_v9  ;;  %v52_v14 = vld [vmem:[#allocation3 + $0x18] sm:$0xff]  ;;  %v53_v16 = vld [vmem:[#allocation3 + $0x20] sm:$0xff] }
   0xf   :  { %v124_v6 = vmul.f32 %v344_v1, %v73_v3  ;;  %v125_v11 = vmul.f32 %v344_v1, %v74_v7  ;;  %v126_v13 = vmul.f32 %v344_v1, %v75_v10  ;;  %v76_v15 = vld [vmem:[#allocation6 + $0x18] sm:$0xff]  ;;  %v101_v18 = vmul.f32 %v342_v0, %v52_v14  ;;  %v77_v20 = vld [vmem:[#allocation6 + $0x20] sm:$0xff]  ;;  %v54_v22 = vld [vmem:[#allocation3 + $0x28] sm:$0xff] }
  0x10   :  { %v127_v19 = vmul.f32 %v344_v1, %v76_v15  ;;  %v102_v21 = vmul.f32 %v342_v0, %v53_v16  ;;  %v78_v23 = vld [vmem:[#allocation6 + $0x28] sm:$0xff]  ;;  %v128_v26 = vmul.f32 %v344_v1, %v77_v20  ;;  %v103_v27 = vmul.f32 %v342_v0, %v54_v22  ;;  %v55_v28 = vld [vmem:[#allocation3 + $0x30] sm:$0xff]  ;;  %v56_v30 = vld [vmem:[#allocation3 + $0x38] sm:$0xff] }
  0x11   :  { %v148_v17 = vadd.f32 %v124_v6, %v98_v5  ;;  %v149_v24 = vadd.f32 %v125_v11, %v99_v8  ;;  %v150_v25 = vadd.f32 %v126_v13, %v100_v12  ;;  %v79_v29 = vld [vmem:[#allocation6 + $0x30] sm:$0xff]  ;;  %v129_v32 = vmul.f32 %v344_v1, %v78_v23  ;;  %v80_v35 = vld [vmem:[#allocation6 + $0x38] sm:$0xff]  ;;  %v57_v36 = vld [vmem:[#allocation3 + $0x40] sm:$0xff] }
  0x12   :  { %v151_v31 = vadd.f32 %v127_v19, %v101_v18  ;;  %v104_v33 = vmul.f32 %v342_v0, %v55_v28  ;;  %v130_v34 = vmul.f32 %v344_v1, %v79_v29  ;;  %v81_v37 = vld [vmem:[#allocation6 + $0x40] sm:$0xff]  ;;  %v152_v38 = vadd.f32 %v128_v26, %v102_v21  ;;  %v58_v42 = vld [vmem:[#allocation3 + $0x48] sm:$0xff]  ;;  %v59_v44 = vld [vmem:[#allocation3 + $0x50] sm:$0xff] }
  0x13   :  { %172 = vst [vmem:[#allocation8] sm:$0xff] %v148_v17  ;;  %v105_v39 = vmul.f32 %v342_v0, %v56_v30  ;;  %v131_v40 = vmul.f32 %v344_v1, %v80_v35  ;;  %v106_v41 = vmul.f32 %v342_v0, %v57_v36  ;;  %v82_v43 = vld [vmem:[#allocation6 + $0x48] sm:$0xff]  ;;  %v153_v45 = vadd.f32 %v129_v32, %v103_v27  ;;  %v83_v49 = vld [vmem:[#allocation6 + $0x50] sm:$0xff]  ;;  %v60_v50 = vld [vmem:[#allocation3 + $0x58] sm:$0xff] }
  0x14   :  { %173 = vst [vmem:[#allocation8 + $0x8] sm:$0xff] %v149_v24  ;;  %v154_v46 = vadd.f32 %v130_v34, %v104_v33  ;;  %v132_v47 = vmul.f32 %v344_v1, %v81_v37  ;;  %v107_v48 = vmul.f32 %v342_v0, %v58_v42  ;;  %v84_v51 = vld [vmem:[#allocation6 + $0x58] sm:$0xff]  ;;  %v133_v53 = vmul.f32 %v344_v1, %v82_v43  ;;  %v61_v56 = vld [vmem:[#allocation3 + $0x60] sm:$0xff]  ;;  %v62_v58 = vld [vmem:[#allocation3 + $0x68] sm:$0xff] }
  0x15   :  { %174 = vst [vmem:[#allocation8 + $0x10] sm:$0xff] %v150_v25  ;;  %v155_v52 = vadd.f32 %v131_v40, %v105_v39  ;;  %v108_v54 = vmul.f32 %v342_v0, %v59_v44  ;;  %v134_v55 = vmul.f32 %v344_v1, %v83_v49  ;;  %v85_v57 = vld [vmem:[#allocation6 + $0x60] sm:$0xff]  ;;  %v109_v60 = vmul.f32 %v342_v0, %v60_v50  ;;  %v86_v63 = vld [vmem:[#allocation6 + $0x68] sm:$0xff]  ;;  %v63_v2 = vld [vmem:[#allocation3 + $0x70] sm:$0xff] }
  0x16   :  { %175 = vst [vmem:[#allocation8 + $0x18] sm:$0xff] %v151_v31  ;;  %v156_v59 = vadd.f32 %v132_v47, %v106_v41  ;;  %v135_v61 = vmul.f32 %v344_v1, %v84_v51  ;;  %v110_v62 = vmul.f32 %v342_v0, %v61_v56  ;;  %v87_v3 = vld [vmem:[#allocation6 + $0x70] sm:$0xff]  ;;  %v157_v4 = vadd.f32 %v133_v53, %v107_v48  ;;  %v64_v7 = vld [vmem:[#allocation3 + $0x78] sm:$0xff]  ;;  %v65_v9 = vld [vmem:[#allocation3 + $0x80] sm:$0xff] }
  0x17   :  { %176 = vst [vmem:[#allocation8 + $0x20] sm:$0xff] %v152_v38  ;;  %v136_v5 = vmul.f32 %v344_v1, %v85_v57  ;;  %v111_v6 = vmul.f32 %v342_v0, %v62_v58  ;;  %v88_v8 = vld [vmem:[#allocation6 + $0x78] sm:$0xff]  ;;  %v158_v10 = vadd.f32 %v134_v55, %v108_v54  ;;  %v137_v11 = vmul.f32 %v344_v1, %v86_v63  ;;  %v89_v14 = vld [vmem:[#allocation6 + $0x80] sm:$0xff]  ;;  %v66_v15 = vld [vmem:[#allocation3 + $0x88] sm:$0xff] }
  0x18   :  { %177 = vst [vmem:[#allocation8 + $0x28] sm:$0xff] %v153_v45  ;;  %v112_v12 = vmul.f32 %v342_v0, %v63_v2  ;;  %v138_v13 = vmul.f32 %v344_v1, %v87_v3  ;;  %v90_v16 = vld [vmem:[#allocation6 + $0x88] sm:$0xff]  ;;  %v159_v17 = vadd.f32 %v135_v61, %v109_v60  ;;  %v113_v18 = vmul.f32 %v342_v0, %v64_v7  ;;  %v67_v20 = vld [vmem:[#allocation3 + $0x90] sm:$0xff]  ;;  %v68_v25 = vld [vmem:[#allocation3 + $0x98] sm:$0xff] }
  0x19   :  { %178 = vst [vmem:[#allocation8 + $0x30] sm:$0xff] %v154_v46  ;;  %v139_v19 = vmul.f32 %v344_v1, %v88_v8  ;;  %v91_v21 = vld [vmem:[#allocation6 + $0x90] sm:$0xff]  ;;  %v160_v22 = vadd.f32 %v136_v5, %v110_v62  ;;  %v114_v23 = vmul.f32 %v342_v0, %v65_v9  ;;  %v140_v24 = vmul.f32 %v344_v1, %v89_v14  ;;  %v92_v26 = vld [vmem:[#allocation6 + $0x98] sm:$0xff]  ;;  %v69_v30 = vld [vmem:[#allocation3 + $0xa0] sm:$0xff] }
  0x1a   :  { %179 = vst [vmem:[#allocation8 + $0x38] sm:$0xff] %v155_v52  ;;  %v161_v27 = vadd.f32 %v137_v11, %v111_v6  ;;  %v115_v28 = vmul.f32 %v342_v0, %v66_v15  ;;  %v141_v29 = vmul.f32 %v344_v1, %v90_v16  ;;  %v93_v31 = vld [vmem:[#allocation6 + $0xa0] sm:$0xff]  ;;  %v162_v32 = vadd.f32 %v138_v13, %v112_v12  ;;  %v70_v35 = vld [vmem:[#allocation3 + $0xa8] sm:$0xff]  ;;  %v71_v40 = vld [vmem:[#allocation3 + $0xb0] sm:$0xff] }
  0x1b   :  { %180 = vst [vmem:[#allocation8 + $0x40] sm:$0xff] %v156_v59  ;;  %v116_v33 = vmul.f32 %v342_v0, %v67_v20  ;;  %v142_v34 = vmul.f32 %v344_v1, %v91_v21  ;;  %v94_v36 = vld [vmem:[#allocation6 + $0xa8] sm:$0xff]  ;;  %v163_v37 = vadd.f32 %v139_v19, %v113_v18  ;;  %v117_v38 = vmul.f32 %v342_v0, %v68_v25  ;;  %v95_v41 = vld [vmem:[#allocation6 + $0xb0] sm:$0xff]  ;;  %v72_v45 = vld [vmem:[#allocation3 + $0xb8] sm:$0xff] }
  0x1c   :  { %181 = vst [vmem:[#allocation8 + $0x48] sm:$0xff] %v157_v4  ;;  %v143_v39 = vmul.f32 %v344_v1, %v92_v26  ;;  %v164_v42 = vadd.f32 %v140_v24, %v114_v23  ;;  %v118_v43 = vmul.f32 %v342_v0, %v69_v30  ;;  %v144_v44 = vmul.f32 %v344_v1, %v93_v31  ;;  %v96_v46 = vld [vmem:[#allocation6 + $0xb8] sm:$0xff] }
  0x1d   :  { %182 = vst [vmem:[#allocation8 + $0x50] sm:$0xff] %v158_v10  ;;  %v165_v47 = vadd.f32 %v141_v29, %v115_v28  ;;  %v119_v48 = vmul.f32 %v342_v0, %v70_v35  ;;  %v145_v49 = vmul.f32 %v344_v1, %v94_v36  ;;  %v166_v50 = vadd.f32 %v142_v34, %v116_v33 }
  0x1e   :  { %183 = vst [vmem:[#allocation8 + $0x58] sm:$0xff] %v159_v17  ;;  %v120_v51 = vmul.f32 %v342_v0, %v71_v40  ;;  %v146_v52 = vmul.f32 %v344_v1, %v95_v41  ;;  %v167_v53 = vadd.f32 %v143_v39, %v117_v38  ;;  %v121_v54 = vmul.f32 %v342_v0, %v72_v45 }
  0x1f   :  { %184 = vst [vmem:[#allocation8 + $0x60] sm:$0xff] %v160_v22  ;;  %v147_v55 = vmul.f32 %v344_v1, %v96_v46  ;;  %v168_v56 = vadd.f32 %v144_v44, %v118_v43  ;;  %v169_v57 = vadd.f32 %v145_v49, %v119_v48 }
  0x20   :  { %185 = vst [vmem:[#allocation8 + $0x68] sm:$0xff] %v161_v27  ;;  %v170_v58 = vadd.f32 %v146_v52, %v120_v51 }
  0x21   :  { %186 = vst [vmem:[#allocation8 + $0x70] sm:$0xff] %v162_v32  ;;  %v171_v59 = vadd.f32 %v147_v55, %v121_v54 }
  0x22   :  { %187 = vst [vmem:[#allocation8 + $0x78] sm:$0xff] %v163_v37 }
  0x23   :  { %188 = vst [vmem:[#allocation8 + $0x80] sm:$0xff] %v164_v42 }
  0x24   :  { %189 = vst [vmem:[#allocation8 + $0x88] sm:$0xff] %v165_v47 }
  0x25   :  { %190 = vst [vmem:[#allocation8 + $0x90] sm:$0xff] %v166_v50 }
  0x26   :  { %191 = vst [vmem:[#allocation8 + $0x98] sm:$0xff] %v167_v53 }
  0x27   :  { %192 = vst [vmem:[#allocation8 + $0xa0] sm:$0xff] %v168_v56 }
  0x28   :  { %193 = vst [vmem:[#allocation8 + $0xa8] sm:$0xff] %v169_v57 }
  0x29   :  { %194 = vst [vmem:[#allocation8 + $0xb0] sm:$0xff] %v170_v58 }
  0x2a   :  { %195 = vst [vmem:[#allocation8 + $0xb8] sm:$0xff] %v171_v59 }
  0x2b   :  { %208 = dma.vmem_to_hbm [thread:$0]  %s201_s27, 3072, %s203_s30, [#allocation5], %s300_s20, %s300_s20, %s301_s21  }
  0x2c   :  { %297 = dma.done.wait [#allocation5], 3072  }
  0x2d   :  { %298 = vsyncadd [#allocation5], 4294964224 }
  0x2e   :  { %213 = vsyncpa [#allocation4], 1 }
  0x2f   :  { %214 = vsyncpa [#allocation7], 1 }
  0x30   :  { %215 = vsyncpa [#allocation5], 1 }

</bundles_post_ra>
